<compile_context>
chip_gen: v6e
topology: v6e:2x2x1
jax: 0.10.0
libtpu: 0.0.40
codegen_flags: <defaults>
</compile_context>

<pallas_src>
import jax
import jax.numpy as jnp
import numpy as np
from jax.experimental import pallas as pl

# ---- model hyper-parameters (small, consistent with the PyTorch __init__) ----
N_LOW_LEVEL_ACTIONS = 4
MAX_N_ABSTRACT_ACTIONS = 3
A = N_LOW_LEVEL_ACTIONS + 1          # n_action_options (low-level tokens + stop token)
M = MAX_N_ABSTRACT_ACTIONS           # number of AbstractAction modules / non-terminal states
T = MAX_N_ABSTRACT_ACTIONS + 1       # n_transition_options (states + terminal)

# Bounds for the (in principle unbounded) PyTorch while-loops.
# TODO(synk): the PyTorch inner token loop and outer state loop are unbounded; we bound
# them at MAX_TOKENS / MAX_STEPS (truncation probability is negligible for these logits).
MAX_TOKENS = 16
MAX_STEPS = 8
NP = MAX_STEPS * M                   # 24 (step, state) pairs, all sampled in one shot

LANES = 128
ROW_NTOK = MAX_TOKENS                # int-slab row 16: #tokens kept per pair
ROW_NEXT = MAX_TOKENS + 1            # int-slab row 17: sampled next_state per pair
INT_ROWS = MAX_TOKENS + 8            # 24 rows (multiple of 8) -> single unmasked store
NEG = -1e9                           # logit padding (never wins argmax, exp() -> 0 in lse)

assert A <= 8 and T <= 8 and M < T and NP < LANES


def _sample_kernel(act_ref, cat_ref, utok_ref, ucat_ref, int_ref, f_ref):
    """Single-invocation kernel: samples every (step, state) component at once.

    Pairs p = step*M + state live on lanes 0..NP-1.
      act_ref  (8,128)            rows 0..A-1 = action logits of pair p's state, pad = -1e9
      cat_ref  (8,128)            rows 0..T-1, cols 0..NP-1 = transition logits of pair p's
                                  state; col NP rows 0..M-1 = init-state logits (extra draw)
      utok_ref (A*MAX_TOKENS,128) uniform noise; row a*MAX_TOKENS + t = option a, position t
      ucat_ref (8,128)            uniform noise for the transition/init draws
      int_ref  (24,128)           rows 0..15 tokens (-1 past stop), row 16 #tokens, row 17 next_state
      f_ref    (8,128)            row 0 summed token log-probs, row 1 transition/init log-prob
    """
    act = act_ref[...]                                   # (8,128)
    cat = cat_ref[...]                                   # (8,128)
    u_tok = jnp.clip(utok_ref[...], 1e-12, 1.0 - 1e-6)   # keep gumbel finite
    u_cat = jnp.clip(ucat_ref[...], 1e-12, 1.0 - 1e-6)
    g_tok = -jnp.log(-jnp.log(u_tok))                    # (80,128) Gumbel noise
    g_cat = -jnp.log(-jnp.log(u_cat))                    # (8,128)

    # ---- logsumexp over action options: once, for all 24 pairs (one vreg pass) ----
    amax = jnp.max(act, axis=0, keepdims=True)                                       # (1,128)
    lse_a = amax + jnp.log(jnp.sum(jnp.exp(act - amax), axis=0, keepdims=True))      # (1,128)

    # ---- Gumbel-max token draws: all pairs x positions at once, options unrolled ----
    best = jnp.full((MAX_TOKENS, LANES), NEG, jnp.float32)
    tok = jnp.zeros((MAX_TOKENS, LANES), jnp.int32)
    logp_tok = jnp.zeros((MAX_TOKENS, LANES), jnp.float32)
    for a in range(A):                                   # static unroll, A = 5
        logit_a = act[a:a + 1, :]                        # (1,128) broadcast over positions
        pert = logit_a + g_tok[a * MAX_TOKENS:(a + 1) * MAX_TOKENS, :]   # (16,128)
        better = pert > best
        best = jnp.where(better, pert, best)
        tok = jnp.where(better, a, tok)
        logp_tok = jnp.where(better, logit_a - lse_a, logp_tok)

    # ---- truncate at first stop token (PyTorch counts its log-prob, drops the token) ----
    stop = A - 1
    pos = jax.lax.broadcasted_iota(jnp.int32, (MAX_TOKENS, LANES), 0)
    first_stop = jnp.min(jnp.where(tok == stop, pos, MAX_TOKENS), axis=0, keepdims=True)  # (1,128)
    keep = pos < first_stop
    lp_mask = pos <= jnp.minimum(first_stop, MAX_TOKENS - 1)
    act_lp = jnp.sum(jnp.where(lp_mask, logp_tok, 0.0), axis=0, keepdims=True)            # (1,128)

    # ---- transition draws for all pairs + the start-state draw (extra column NP) ----
    cmax = jnp.max(cat, axis=0, keepdims=True)
    lse_c = cmax + jnp.log(jnp.sum(jnp.exp(cat - cmax), axis=0, keepdims=True))
    bestc = jnp.full((1, LANES), NEG, jnp.float32)
    pick = jnp.zeros((1, LANES), jnp.int32)
    logp_pick = jnp.zeros((1, LANES), jnp.float32)
    for r in range(T):                                   # static unroll, T = 4
        logit_r = cat[r:r + 1, :]
        pert = logit_r + g_cat[r:r + 1, :]
        better = pert > bestc
        bestc = jnp.where(better, pert, bestc)
        pick = jnp.where(better, r, pick)
        logp_pick = jnp.where(better, logit_r - lse_c, logp_pick)

    # ---- assemble two lane-dense output slabs; one unmasked full-array store each ----
    int_ref[...] = jnp.concatenate(
        [jnp.where(keep, tok, -1), first_stop, pick,
         jnp.zeros((INT_ROWS - MAX_TOKENS - 2, LANES), jnp.int32)], axis=0)
    f_ref[...] = jnp.concatenate(
        [act_lp, logp_pick, jnp.zeros((6, LANES), jnp.float32)], axis=0)


@jax.jit
def sample_components(key, init_params, action_params, transition_params):
    """One gridless pallas_call that pre-samples AbstractAction.forward() for every (step, state)."""
    pair_state = jnp.arange(NP, dtype=jnp.int32) % M     # state of pair p = p % M

    act_tile = jnp.full((8, LANES), NEG, jnp.float32)
    act_tile = act_tile.at[:A, :NP].set(action_params.astype(jnp.float32)[pair_state].T)

    cat_tile = jnp.full((8, LANES), NEG, jnp.float32)
    cat_tile = cat_tile.at[:T, :NP].set(transition_params.astype(jnp.float32)[pair_state].T)
    cat_tile = cat_tile.at[:M, NP].set(init_params.astype(jnp.float32))   # start-state draw

    k1, k2 = jax.random.split(key)
    u_tok = jax.random.uniform(k1, (A * MAX_TOKENS, LANES), jnp.float32)
    u_cat = jax.random.uniform(k2, (8, LANES), jnp.float32)

    return pl.pallas_call(
        _sample_kernel,
        out_shape=(jax.ShapeDtypeStruct((INT_ROWS, LANES), jnp.int32),
                   jax.ShapeDtypeStruct((8, LANES), jnp.float32)),
        # No grid / no BlockSpecs: single invocation, full arrays resident in VMEM
        # (total live data is a few tens of KB on every TPU generation).
    )(act_tile, cat_tile, u_tok, u_cat)


def action_abstraction_forward(key, init_params, action_params, transition_params):
    """Host-side reproduction of ActionAbstractionModel.forward() + Sequence assembly."""
    int_out, f_out = sample_components(key, init_params, action_params, transition_params)
    jax.block_until_ready((int_out, f_out))
    ints = np.asarray(int_out)
    flts = np.asarray(f_out)

    tokens = ints[:MAX_TOKENS, :NP]                      # [position, pair]
    ntok = ints[ROW_NTOK, :NP]
    nexts = ints[ROW_NEXT, :NP]
    comp_lp = flts[0, :NP] + flts[1, :NP]
    # Start-state log-prob counts, but PyTorch immediately overrides curr_state = 0.
    start_lp = float(flts[1, NP])

    seq = {'components': [], 'full_sequence': [], 'abstract_actions_used': set(),
           'total_logprob': start_lp}
    terminal = T - 1
    curr_state = 0
    step = 0
    while curr_state != terminal:
        if step >= MAX_STEPS:
            # TODO(synk): PyTorch outer while-loop is unbounded; truncated at MAX_STEPS.
            break
        p = step * M + curr_state
        n = int(ntok[p])
        comp = {'tokens': [int(t) for t in tokens[:n, p]],
                'next_state': int(nexts[p]),
                'logprob': float(comp_lp[p]),
                'AbstractActionName': f'op_{curr_state + 1}'}
        seq['components'].append(comp)
        seq['full_sequence'] += comp['tokens']
        seq['abstract_actions_used'].add(comp['AbstractActionName'])
        seq['total_logprob'] += comp['logprob']
        curr_state = comp['next_state']
        step += 1
    seq['tokens'] = ''.join(str(t) for t in seq['full_sequence'])
    return seq, (int_out, f_out)


if __name__ == "__main__":
    key = jax.random.PRNGKey(0)
    kp1, kp2, kp3, ksample = jax.random.split(key, 4)
    # Deterministic stand-ins for the torch.randn parameters:
    init_state_params = jax.random.normal(kp1, (M,), jnp.float32)      # init_state_params
    action_params = jax.random.normal(kp2, (M, A), jnp.float32)        # per-AbstractAction action_params
    transition_params = jax.random.normal(kp3, (M, T), jnp.float32)    # per-AbstractAction transition_params

    seq, outs = action_abstraction_forward(ksample, init_state_params, action_params,
                                           transition_params)
    jax.block_until_ready(outs)
    print("KERNEL_OK")
</pallas_src>

<mosaic_0001>
module attributes {stable_mosaic.version = 11 : i64} {
  func.func @_sample_kernel(%arg0: memref<8x128xf32, #tpu.memory_space<vmem>>, %arg1: memref<8x128xf32, #tpu.memory_space<vmem>>, %arg2: memref<80x128xf32, #tpu.memory_space<vmem>>, %arg3: memref<8x128xf32, #tpu.memory_space<vmem>>, %arg4: memref<24x128xi32, #tpu.memory_space<vmem>>, %arg5: memref<8x128xf32, #tpu.memory_space<vmem>>) attributes {dimension_semantics = [], scalar_prefetch = 0 : i64, scratch_operands = 0 : i64, tpu.core_type = #tpu.core_type<tc>} {
    %c0 = arith.constant 0 : index
    %c0_0 = arith.constant 0 : index
    %0 = vector.load %arg0[%c0, %c0_0] : memref<8x128xf32, #tpu.memory_space<vmem>>, vector<8x128xf32>
    %c0_1 = arith.constant 0 : index
    %c0_2 = arith.constant 0 : index
    %1 = vector.load %arg1[%c0_1, %c0_2] : memref<8x128xf32, #tpu.memory_space<vmem>>, vector<8x128xf32>
    %c0_3 = arith.constant 0 : index
    %c0_4 = arith.constant 0 : index
    %2 = vector.load %arg2[%c0_3, %c0_4] : memref<80x128xf32, #tpu.memory_space<vmem>>, vector<80x128xf32>
    %cst = arith.constant 9.99999996E-13 : f32
    %cst_5 = arith.constant 0.999998986 : f32
    %3 = vector.broadcast %cst : f32 to vector<80x128xf32>
    %4 = arith.maximumf %3, %2 : vector<80x128xf32>
    %5 = vector.broadcast %cst_5 : f32 to vector<80x128xf32>
    %6 = arith.minimumf %5, %4 : vector<80x128xf32>
    %c0_6 = arith.constant 0 : index
    %c0_7 = arith.constant 0 : index
    %7 = vector.load %arg3[%c0_6, %c0_7] : memref<8x128xf32, #tpu.memory_space<vmem>>, vector<8x128xf32>
    %cst_8 = arith.constant 9.99999996E-13 : f32
    %cst_9 = arith.constant 0.999998986 : f32
    %8 = vector.broadcast %cst_8 : f32 to vector<8x128xf32>
    %9 = arith.maximumf %8, %7 : vector<8x128xf32>
    %10 = vector.broadcast %cst_9 : f32 to vector<8x128xf32>
    %11 = arith.minimumf %10, %9 : vector<8x128xf32>
    %12 = math.log %6 : vector<80x128xf32>
    %cst_10 = arith.constant 0.000000e+00 : f32
    %13 = vector.broadcast %cst_10 : f32 to vector<80x128xf32>
    %14 = arith.subf %13, %12 : vector<80x128xf32>
    %15 = math.log %14 : vector<80x128xf32>
    %cst_11 = arith.constant 0.000000e+00 : f32
    %16 = vector.broadcast %cst_11 : f32 to vector<80x128xf32>
    %17 = arith.subf %16, %15 : vector<80x128xf32>
    %18 = math.log %11 : vector<8x128xf32>
    %cst_12 = arith.constant 0.000000e+00 : f32
    %19 = vector.broadcast %cst_12 : f32 to vector<8x128xf32>
    %20 = arith.subf %19, %18 : vector<8x128xf32>
    %21 = math.log %20 : vector<8x128xf32>
    %cst_13 = arith.constant 0.000000e+00 : f32
    %22 = vector.broadcast %cst_13 : f32 to vector<8x128xf32>
    %23 = arith.subf %22, %21 : vector<8x128xf32>
    %cst_14 = arith.constant dense<0xFF800000> : vector<128xf32>
    %24 = vector.multi_reduction <maximumf>, %0, %cst_14 [0] : vector<8x128xf32> to vector<128xf32>
    %25 = vector.shape_cast %24 : vector<128xf32> to vector<1x128xf32>
    %26 = vector.broadcast %25 : vector<1x128xf32> to vector<8x128xf32>
    %27 = arith.subf %0, %26 : vector<8x128xf32>
    %28 = math.exp %27 : vector<8x128xf32>
    %cst_15 = arith.constant dense<0.000000e+00> : vector<128xf32>
    %29 = vector.multi_reduction <add>, %28, %cst_15 [0] : vector<8x128xf32> to vector<128xf32>
    %30 = vector.shape_cast %29 : vector<128xf32> to vector<1x128xf32>
    %31 = math.log %30 : vector<1x128xf32>
    %32 = arith.addf %25, %31 : vector<1x128xf32>
    %cst_16 = arith.constant -1.000000e+09 : f32
    %33 = vector.broadcast %cst_16 : f32 to vector<16x128xf32>
    %c0_i32 = arith.constant 0 : i32
    %34 = vector.broadcast %c0_i32 : i32 to vector<16x128xi32>
    %cst_17 = arith.constant 0.000000e+00 : f32
    %35 = vector.broadcast %cst_17 : f32 to vector<16x128xf32>
    %36 = vector.extract_strided_slice %0 {offsets = [0, 0], sizes = [1, 128], strides = [1, 1]} : vector<8x128xf32> to vector<1x128xf32>
    %37 = vector.extract_strided_slice %17 {offsets = [0, 0], sizes = [16, 128], strides = [1, 1]} : vector<80x128xf32> to vector<16x128xf32>
    %38 = vector.broadcast %36 : vector<1x128xf32> to vector<16x128xf32>
    %39 = arith.addf %38, %37 : vector<16x128xf32>
    %40 = arith.cmpf ogt, %39, %33 : vector<16x128xf32>
    %41 = arith.select %40, %39, %33 : vector<16x128xi1>, vector<16x128xf32>
    %c0_i32_18 = arith.constant 0 : i32
    %42 = vector.broadcast %c0_i32_18 : i32 to vector<16x128xi32>
    %43 = arith.select %40, %42, %34 : vector<16x128xi1>, vector<16x128xi32>
    %44 = arith.subf %36, %32 : vector<1x128xf32>
    %45 = vector.shape_cast %44 : vector<1x128xf32> to vector<1x128xf32>
    %46 = vector.broadcast %45 : vector<1x128xf32> to vector<16x128xf32>
    %47 = arith.select %40, %46, %35 : vector<16x128xi1>, vector<16x128xf32>
    %48 = vector.extract_strided_slice %0 {offsets = [1, 0], sizes = [1, 128], strides = [1, 1]} : vector<8x128xf32> to vector<1x128xf32>
    %49 = vector.extract_strided_slice %17 {offsets = [16, 0], sizes = [16, 128], strides = [1, 1]} : vector<80x128xf32> to vector<16x128xf32>
    %50 = vector.broadcast %48 : vector<1x128xf32> to vector<16x128xf32>
    %51 = arith.addf %50, %49 : vector<16x128xf32>
    %52 = arith.cmpf ogt, %51, %41 : vector<16x128xf32>
    %53 = arith.select %52, %51, %41 : vector<16x128xi1>, vector<16x128xf32>
    %c1_i32 = arith.constant 1 : i32
    %54 = vector.broadcast %c1_i32 : i32 to vector<16x128xi32>
    %55 = arith.select %52, %54, %43 : vector<16x128xi1>, vector<16x128xi32>
    %56 = arith.subf %48, %32 : vector<1x128xf32>
    %57 = vector.shape_cast %56 : vector<1x128xf32> to vector<1x128xf32>
    %58 = vector.broadcast %57 : vector<1x128xf32> to vector<16x128xf32>
    %59 = arith.select %52, %58, %47 : vector<16x128xi1>, vector<16x128xf32>
    %60 = vector.extract_strided_slice %0 {offsets = [2, 0], sizes = [1, 128], strides = [1, 1]} : vector<8x128xf32> to vector<1x128xf32>
    %61 = vector.extract_strided_slice %17 {offsets = [32, 0], sizes = [16, 128], strides = [1, 1]} : vector<80x128xf32> to vector<16x128xf32>
    %62 = vector.broadcast %60 : vector<1x128xf32> to vector<16x128xf32>
    %63 = arith.addf %62, %61 : vector<16x128xf32>
    %64 = arith.cmpf ogt, %63, %53 : vector<16x128xf32>
    %65 = arith.select %64, %63, %53 : vector<16x128xi1>, vector<16x128xf32>
    %c2_i32 = arith.constant 2 : i32
    %66 = vector.broadcast %c2_i32 : i32 to vector<16x128xi32>
    %67 = arith.select %64, %66, %55 : vector<16x128xi1>, vector<16x128xi32>
    %68 = arith.subf %60, %32 : vector<1x128xf32>
    %69 = vector.shape_cast %68 : vector<1x128xf32> to vector<1x128xf32>
    %70 = vector.broadcast %69 : vector<1x128xf32> to vector<16x128xf32>
    %71 = arith.select %64, %70, %59 : vector<16x128xi1>, vector<16x128xf32>
    %72 = vector.extract_strided_slice %0 {offsets = [3, 0], sizes = [1, 128], strides = [1, 1]} : vector<8x128xf32> to vector<1x128xf32>
    %73 = vector.extract_strided_slice %17 {offsets = [48, 0], sizes = [16, 128], strides = [1, 1]} : vector<80x128xf32> to vector<16x128xf32>
    %74 = vector.broadcast %72 : vector<1x128xf32> to vector<16x128xf32>
    %75 = arith.addf %74, %73 : vector<16x128xf32>
    %76 = arith.cmpf ogt, %75, %65 : vector<16x128xf32>
    %77 = arith.select %76, %75, %65 : vector<16x128xi1>, vector<16x128xf32>
    %c3_i32 = arith.constant 3 : i32
    %78 = vector.broadcast %c3_i32 : i32 to vector<16x128xi32>
    %79 = arith.select %76, %78, %67 : vector<16x128xi1>, vector<16x128xi32>
    %80 = arith.subf %72, %32 : vector<1x128xf32>
    %81 = vector.shape_cast %80 : vector<1x128xf32> to vector<1x128xf32>
    %82 = vector.broadcast %81 : vector<1x128xf32> to vector<16x128xf32>
    %83 = arith.select %76, %82, %71 : vector<16x128xi1>, vector<16x128xf32>
    %84 = vector.extract_strided_slice %0 {offsets = [4, 0], sizes = [1, 128], strides = [1, 1]} : vector<8x128xf32> to vector<1x128xf32>
    %85 = vector.extract_strided_slice %17 {offsets = [64, 0], sizes = [16, 128], strides = [1, 1]} : vector<80x128xf32> to vector<16x128xf32>
    %86 = vector.broadcast %84 : vector<1x128xf32> to vector<16x128xf32>
    %87 = arith.addf %86, %85 : vector<16x128xf32>
    %88 = arith.cmpf ogt, %87, %77 : vector<16x128xf32>
    %c4_i32 = arith.constant 4 : i32
    %89 = vector.broadcast %c4_i32 : i32 to vector<16x128xi32>
    %90 = arith.select %88, %89, %79 : vector<16x128xi1>, vector<16x128xi32>
    %91 = arith.subf %84, %32 : vector<1x128xf32>
    %92 = vector.shape_cast %91 : vector<1x128xf32> to vector<1x128xf32>
    %93 = vector.broadcast %92 : vector<1x128xf32> to vector<16x128xf32>
    %94 = arith.select %88, %93, %83 : vector<16x128xi1>, vector<16x128xf32>
    %95 = tpu.iota {dimensions = array<i32: 0>} : vector<16x128xi32>
    %c4_i32_19 = arith.constant 4 : i32
    %96 = vector.broadcast %c4_i32_19 : i32 to vector<16x128xi32>
    %97 = arith.cmpi eq, %90, %96 : vector<16x128xi32>
    %c16_i32 = arith.constant 16 : i32
    %98 = vector.broadcast %c16_i32 : i32 to vector<16x128xi32>
    %99 = arith.select %97, %95, %98 : vector<16x128xi1>, vector<16x128xi32>
    %cst_20 = arith.constant dense<2147483647> : vector<128xi32>
    %100 = vector.multi_reduction <minsi>, %99, %cst_20 [0] : vector<16x128xi32> to vector<128xi32>
    %101 = vector.shape_cast %100 : vector<128xi32> to vector<1x128xi32>
    %102 = vector.broadcast %101 : vector<1x128xi32> to vector<16x128xi32>
    %103 = arith.cmpi slt, %95, %102 : vector<16x128xi32>
    %c15_i32 = arith.constant 15 : i32
    %104 = vector.broadcast %c15_i32 : i32 to vector<1x128xi32>
    %105 = arith.minsi %101, %104 : vector<1x128xi32>
    %106 = vector.broadcast %105 : vector<1x128xi32> to vector<16x128xi32>
    %107 = arith.cmpi sle, %95, %106 : vector<16x128xi32>
    %cst_21 = arith.constant 0.000000e+00 : f32
    %108 = vector.broadcast %cst_21 : f32 to vector<16x128xf32>
    %109 = arith.select %107, %94, %108 : vector<16x128xi1>, vector<16x128xf32>
    %cst_22 = arith.constant dense<0.000000e+00> : vector<128xf32>
    %110 = vector.multi_reduction <add>, %109, %cst_22 [0] : vector<16x128xf32> to vector<128xf32>
    %111 = vector.shape_cast %110 : vector<128xf32> to vector<1x128xf32>
    %cst_23 = arith.constant dense<0xFF800000> : vector<128xf32>
    %112 = vector.multi_reduction <maximumf>, %1, %cst_23 [0] : vector<8x128xf32> to vector<128xf32>
    %113 = vector.shape_cast %112 : vector<128xf32> to vector<1x128xf32>
    %114 = vector.broadcast %113 : vector<1x128xf32> to vector<8x128xf32>
    %115 = arith.subf %1, %114 : vector<8x128xf32>
    %116 = math.exp %115 : vector<8x128xf32>
    %cst_24 = arith.constant dense<0.000000e+00> : vector<128xf32>
    %117 = vector.multi_reduction <add>, %116, %cst_24 [0] : vector<8x128xf32> to vector<128xf32>
    %118 = vector.shape_cast %117 : vector<128xf32> to vector<1x128xf32>
    %119 = math.log %118 : vector<1x128xf32>
    %120 = arith.addf %113, %119 : vector<1x128xf32>
    %cst_25 = arith.constant -1.000000e+09 : f32
    %121 = vector.broadcast %cst_25 : f32 to vector<1x128xf32>
    %c0_i32_26 = arith.constant 0 : i32
    %122 = vector.broadcast %c0_i32_26 : i32 to vector<1x128xi32>
    %cst_27 = arith.constant 0.000000e+00 : f32
    %123 = vector.broadcast %cst_27 : f32 to vector<1x128xf32>
    %124 = vector.extract_strided_slice %1 {offsets = [0, 0], sizes = [1, 128], strides = [1, 1]} : vector<8x128xf32> to vector<1x128xf32>
    %125 = vector.extract_strided_slice %23 {offsets = [0, 0], sizes = [1, 128], strides = [1, 1]} : vector<8x128xf32> to vector<1x128xf32>
    %126 = arith.addf %124, %125 : vector<1x128xf32>
    %127 = arith.cmpf ogt, %126, %121 : vector<1x128xf32>
    %128 = arith.select %127, %126, %121 : vector<1x128xi1>, vector<1x128xf32>
    %c0_i32_28 = arith.constant 0 : i32
    %129 = vector.broadcast %c0_i32_28 : i32 to vector<1x128xi32>
    %130 = arith.select %127, %129, %122 : vector<1x128xi1>, vector<1x128xi32>
    %131 = arith.subf %124, %120 : vector<1x128xf32>
    %132 = arith.select %127, %131, %123 : vector<1x128xi1>, vector<1x128xf32>
    %133 = vector.extract_strided_slice %1 {offsets = [1, 0], sizes = [1, 128], strides = [1, 1]} : vector<8x128xf32> to vector<1x128xf32>
    %134 = vector.extract_strided_slice %23 {offsets = [1, 0], sizes = [1, 128], strides = [1, 1]} : vector<8x128xf32> to vector<1x128xf32>
    %135 = arith.addf %133, %134 : vector<1x128xf32>
    %136 = arith.cmpf ogt, %135, %128 : vector<1x128xf32>
    %137 = arith.select %136, %135, %128 : vector<1x128xi1>, vector<1x128xf32>
    %c1_i32_29 = arith.constant 1 : i32
    %138 = vector.broadcast %c1_i32_29 : i32 to vector<1x128xi32>
    %139 = arith.select %136, %138, %130 : vector<1x128xi1>, vector<1x128xi32>
    %140 = arith.subf %133, %120 : vector<1x128xf32>
    %141 = arith.select %136, %140, %132 : vector<1x128xi1>, vector<1x128xf32>
    %142 = vector.extract_strided_slice %1 {offsets = [2, 0], sizes = [1, 128], strides = [1, 1]} : vector<8x128xf32> to vector<1x128xf32>
    %143 = vector.extract_strided_slice %23 {offsets = [2, 0], sizes = [1, 128], strides = [1, 1]} : vector<8x128xf32> to vector<1x128xf32>
    %144 = arith.addf %142, %143 : vector<1x128xf32>
    %145 = arith.cmpf ogt, %144, %137 : vector<1x128xf32>
    %146 = arith.select %145, %144, %137 : vector<1x128xi1>, vector<1x128xf32>
    %c2_i32_30 = arith.constant 2 : i32
    %147 = vector.broadcast %c2_i32_30 : i32 to vector<1x128xi32>
    %148 = arith.select %145, %147, %139 : vector<1x128xi1>, vector<1x128xi32>
    %149 = arith.subf %142, %120 : vector<1x128xf32>
    %150 = arith.select %145, %149, %141 : vector<1x128xi1>, vector<1x128xf32>
    %151 = vector.extract_strided_slice %1 {offsets = [3, 0], sizes = [1, 128], strides = [1, 1]} : vector<8x128xf32> to vector<1x128xf32>
    %152 = vector.extract_strided_slice %23 {offsets = [3, 0], sizes = [1, 128], strides = [1, 1]} : vector<8x128xf32> to vector<1x128xf32>
    %153 = arith.addf %151, %152 : vector<1x128xf32>
    %154 = arith.cmpf ogt, %153, %146 : vector<1x128xf32>
    %c3_i32_31 = arith.constant 3 : i32
    %155 = vector.broadcast %c3_i32_31 : i32 to vector<1x128xi32>
    %156 = arith.select %154, %155, %148 : vector<1x128xi1>, vector<1x128xi32>
    %157 = arith.subf %151, %120 : vector<1x128xf32>
    %158 = arith.select %154, %157, %150 : vector<1x128xi1>, vector<1x128xf32>
    %c-1_i32 = arith.constant -1 : i32
    %159 = vector.broadcast %c-1_i32 : i32 to vector<16x128xi32>
    %160 = arith.select %103, %90, %159 : vector<16x128xi1>, vector<16x128xi32>
    %c0_i32_32 = arith.constant 0 : i32
    %161 = vector.broadcast %c0_i32_32 : i32 to vector<6x128xi32>
    %162 = tpu.concatenate %160, %101, %156, %161 in 0 : vector<16x128xi32>, vector<1x128xi32>, vector<1x128xi32>, vector<6x128xi32> -> vector<24x128xi32>
    %c0_33 = arith.constant 0 : index
    %c0_34 = arith.constant 0 : index
    %163 = vector.load %arg4[%c0_33, %c0_34] : memref<24x128xi32, #tpu.memory_space<vmem>>, vector<24x128xi32>
    tpu.vector_store %arg4[%c0_33, %c0_34], %162 {strides = array<i32>} : memref<24x128xi32, #tpu.memory_space<vmem>>, vector<24x128xi32>,
    %cst_35 = arith.constant 0.000000e+00 : f32
    %164 = vector.broadcast %cst_35 : f32 to vector<6x128xf32>
    %165 = tpu.concatenate %111, %158, %164 in 0 : vector<1x128xf32>, vector<1x128xf32>, vector<6x128xf32> -> vector<8x128xf32>
    %c0_36 = arith.constant 0 : index
    %c0_37 = arith.constant 0 : index
    %166 = vector.load %arg5[%c0_36, %c0_37] : memref<8x128xf32, #tpu.memory_space<vmem>>, vector<8x128xf32>
    tpu.vector_store %arg5[%c0_36, %c0_37], %165 {strides = array<i32>} : memref<8x128xf32, #tpu.memory_space<vmem>>, vector<8x128xf32>,
    return
  }
}

</mosaic_0001>

<bundles_post_ra>
// kernel: sample_components.3
= control target key start
LH: loop header
LB: loop body
LE: loop exit
PB: predicated region body
PF: predicated region fallthrough
CT: control target
= control target key end

     0   :  { %11 = vsyncpa [#allocation3], 0  ;;  %s798_s0 = inlined_call_operand.vmem [shape: f32[8,128], index: 0, kind: input, shape index: {}]   ;;  %s799_s1 = inlined_call_operand.vmem [shape: f32[8,128], index: 1, kind: input, shape index: {}]   ;;  %s800_s2 = inlined_call_operand.vmem [shape: f32[80,128], index: 2, kind: input, shape index: {}]   ;;  %s801_s3 = inlined_call_operand.vmem [shape: f32[8,128], index: 3, kind: input, shape index: {}]   ;;  %s802_s4 = inlined_call_operand.hbm [shape: s32[24,128], index: 4, kind: output, shape index: {0}]   ;;  %s803_s5 = inlined_call_operand.hbm [shape: f32[8,128], index: 5, kind: output, shape index: {1}]  }
   0x1   :  { %v499_v0 = vld [vmem:[%s798_s0] sm:$0xff]  ;;  %v24_v3 = vld [vmem:[%s800_s2 + $0x8] sm:$0xff]  ;;  %v25_v4 = vld [vmem:[%s800_s2 + $0x10] sm:$0xff] }
   0x2   :  { %v504_v1 = vld [vmem:[%s799_s1] sm:$0xff]  ;;  %v26_v5 = vld [vmem:[%s800_s2 + $0x18] sm:$0xff]  ;;  %v122_v6 = vrot.slane %v499_v0, 4  ;;  %v28_v8 = vld [vmem:[%s800_s2 + $0x28] sm:$0xff]  ;;  %v34_v10 = vmax.f32 %v24_v3, 1e-12 }
   0x3   :  { %v23_v2 = vld [vmem:[%s800_s2] sm:$0xff]  ;;  %v29_v11 = vld [vmem:[%s800_s2 + $0x30] sm:$0xff]  ;;  %v35_v12 = vmax.f32 %v25_v4, 1e-12  ;;  %v30_v13 = vld [vmem:[%s800_s2 + $0x38] sm:$0xff]  ;;  %v260_v20 = vrot.slane %v504_v1, 4 }
   0x4   :  { %v27_v7 = vld [vmem:[%s800_s2 + $0x20] sm:$0xff]  ;;  %v33_v9 = vmax.f32 %v23_v2, 1e-12  ;;  %v36_v14 = vmax.f32 %v26_v5, 1e-12  ;;  %v32_v17 = vld [vmem:[%s800_s2 + $0x48] sm:$0xff]  ;;  %v123_v19 = vmax.f32 %v499_v0, %v122_v6 }
   0x5   :  { %v37_v15 = vmax.f32 %v27_v7, 1e-12  ;;  %v31_v16 = vld [vmem:[%s800_s2 + $0x40] sm:$0xff]  ;;  %v38_v18 = vmax.f32 %v28_v8, 1e-12  ;;  %v261_v35 = vmax.f32 %v504_v1, %v260_v20 }
   0x6   :  { %v39_v21 = vmax.f32 %v29_v11, 1e-12  ;;  %v43_v22 = vmin.f32 %v33_v9, 0.999999  ;;  %v44_v23 = vmin.f32 %v34_v10, 0.999999 }
   0x7   :  { %v40_v24 = vmax.f32 %v30_v13, 1e-12  ;;  %v45_v25 = vmin.f32 %v35_v12, 0.999999  ;;  %v46_v26 = vmin.f32 %v36_v14, 0.999999 }
   0x8   :  { %v41_v27 = vmax.f32 %v31_v16, 1e-12  ;;  %v47_v28 = vmin.f32 %v37_v15, 0.999999  ;;  %365 = vlog2.f32 %v43_v22  ;;  %v42_v29 = vmax.f32 %v32_v17, 1e-12 }
   0x9   :  { %v48_v30 = vmin.f32 %v38_v18, 0.999999  ;;  %v53_v31 = vld [vmem:[%s801_s3] sm:$0xff]  ;;  %367 = vlog2.f32 %v44_v23  ;;  %v124_v32 = vrot.slane %v123_v19, 2  ;;  %v49_v33 = vmin.f32 %v39_v21, 0.999999 }
   0xa   :  { %v54_v34 = vmax.f32 %v53_v31, 1e-12  ;;  %369 = vlog2.f32 %v45_v25  ;;  %v50_v36 = vmin.f32 %v40_v24, 0.999999 }
   0xb   :  { %371 = vlog2.f32 %v46_v26  ;;  %v125_v37 = vmax.f32 %v123_v19, %v124_v32 }
   0xc   :  { %12 = vsyncpa [#allocation5], 0  ;;  %v51_v38 = vmin.f32 %v41_v27, 0.999999  ;;  %373 = vlog2.f32 %v47_v28  ;;  %v52_v39 = vmin.f32 %v42_v29, 0.999999  ;;  %v140_v7 = vlaneseq }
   0xd   :  { %375 = vlog2.f32 %v48_v30  ;;  %v126_v40 = vrot.slane %v125_v37, 1  ;;  %v55_v41 = vmin.f32 %v54_v34, 0.999999  ;;  %v262_v42 = vrot.slane %v261_v35, 2  ;;  %s462_s2 = smov [#allocation2]  }
   0xe   :  { %377 = vlog2.f32 %v49_v33  ;;  %v551_v20 = vshrl.u32 %v140_v7, 7  ;;  %s335_s3 = sshll.u32 %s462_s2, 4  ;;  %s336_s3 = int_to_ptr.vmem [resolvable:$true] %s335_s3 }
   0xf   :  { %379 = vlog2.f32 %v50_v36  ;;  %v543_v43 = vmax.f32 %v125_v37, %v126_v40  ;;  %v263_v45 = vmax.f32 %v261_v35, %v262_v42  ;;  %s417_s17 = scalar_lea.vmem %s336_s3, 384  ;;  %p422_p1 = scmp.lt.s32.totalorder %s336_s3, %s336_s3 }
  0x10   :  { %381 = vlog2.f32 %v51_v38  ;;  %v142_v26 = vsub.s32 0, %v551_v20  ;;  %v159_v28 = vsub.s32 1, %v551_v20  ;;  %v177_v29 = vsub.s32 2, %v551_v20  ;;  %p418_p0 = scmp.ne.s32.totalorder %s336_s3, %s417_s17  ;;  %p423_p2 = scmp.lt.s32.totalorder %s417_s17, %s417_s17 }
  0x11   :  { %383 = vlog2.f32 %v52_v39  ;;  %v128_v44 = vsub.f32 %v499_v0, %v543_v43  ;;  %v264_v48 = vrot.slane %v263_v45, 1  ;;  %v195_v32 = vsub.s32 3, %v551_v20 }
  0x12   :  { %385 = vlog2.f32 %v55_v41  ;;  %v143_v35 = vrot.slane %v499_v0, %v142_v26  ;;  %v213_v36 = vsub.s32 4, %v551_v20  ;;  %p424_p3 = por %p423_p2, %p422_p1 }
  0x13   :  { %v129_v46 = vmul.f32 1.442695, %v128_v44  ;;  %v547_v59 = vmax.f32 %v263_v45, %v264_v48  ;;  %v160_v44 = vrot.slane %v499_v0, %v159_v28  ;;  %v178_v45 = vrot.slane %v499_v0, %v177_v29 }
  0x14   :  { %p425_p4 = pnand %p424_p3, %p418_p0 }
  0x15   :  { %v366_v47 = vpop.eup %365  ;;  %387 = vpow2.f32 %v129_v46  ;;  %v266_v11 = vsub.f32 %v504_v1, %v547_v59 }
  0x16   :  { %v368_v49 = vpop.eup %367  ;;  %v57_v50 = vmul.f32 0.6931472, %v366_v47 }
  0x17   :  { %v370_v51 = vpop.eup %369  ;;  %v59_v52 = vmul.f32 0.6931472, %v368_v49  ;;  %v267_v22 = vmul.f32 1.442695, %v266_v11 }
  0x18   :  { %v372_v53 = vpop.eup %371  ;;  %v61_v54 = vmul.f32 0.6931472, %v370_v51  ;;  %v76_v55 = vsub.f32 0.0, %v57_v50  ;;  %v196_v50 = vrot.slane %v499_v0, %v195_v32 }
  0x19   :  { %v374_v56 = vpop.eup %373  ;;  %v63_v57 = vmul.f32 0.6931472, %v372_v53  ;;  %v77_v58 = vsub.f32 0.0, %v59_v52 }
  0x1a   :  { %v376_v60 = vpop.eup %375  ;;  %v65_v61 = vmul.f32 0.6931472, %v374_v56  ;;  %v78_v62 = vsub.f32 0.0, %v61_v54  ;;  %389 = vlog2.f32 %v76_v55  ;;  %v214_v55 = vrot.slane %v499_v0, %v213_v36 }
  0x1b   :  { %v378_v63 = vpop.eup %377  ;;  %v67_v2 = vmul.f32 0.6931472, %v376_v60  ;;  %v79_v3 = vsub.f32 0.0, %v63_v57  ;;  %391 = vlog2.f32 %v77_v58 }
  0x1c   :  { %v380_v4 = vpop.eup %379  ;;  %v69_v5 = vmul.f32 0.6931472, %v378_v63  ;;  %v80_v6 = vsub.f32 0.0, %v65_v61  ;;  %393 = vlog2.f32 %v78_v62 }
  0x1d   :  { %v382_v8 = vpop.eup %381  ;;  %v71_v9 = vmul.f32 0.6931472, %v380_v4  ;;  %v81_v10 = vsub.f32 0.0, %v67_v2  ;;  %395 = vlog2.f32 %v79_v3 }
  0x1e   :  { %v384_v12 = vpop.eup %383  ;;  %v73_v13 = vmul.f32 0.6931472, %v382_v8  ;;  %v82_v14 = vsub.f32 0.0, %v69_v5  ;;  %397 = vlog2.f32 %v80_v6 }
  0x1f   :  { %v386_v15 = vpop.eup %385  ;;  %v75_v16 = vmul.f32 0.6931472, %v384_v12  ;;  %v83_v17 = vsub.f32 0.0, %v71_v9  ;;  %399 = vlog2.f32 %v81_v10 }
  0x20   :  { %v84_v18 = vsub.f32 0.0, %v73_v13  ;;  %401 = vlog2.f32 %v82_v14  ;;  %v117_v19 = vmul.f32 0.6931472, %v386_v15 }
  0x21   :  { %v85_v21 = vsub.f32 0.0, %v75_v16  ;;  %403 = vlog2.f32 %v83_v17 }
  0x22   :  { %v388_v23 = vpop.eup %387  ;;  %405 = vlog2.f32 %v84_v18  ;;  %v118_v24 = vsub.f32 0.0, %v117_v19 }
  0x23   :  { %407 = vlog2.f32 %v85_v21  ;;  %v131_v25 = vrot.slane %v388_v23, 4 }
  0x24   :  { %409 = vlog2.f32 %v118_v24 }
  0x25   :  { %v132_v27 = vadd.f32 %v388_v23, %v131_v25  ;;  %411 = vpow2.f32 %v267_v22  ;;  %v461_v23 = vmov 0  }
  0x27   :  { %v390_v30 = vpop.eup %389  ;;  %v133_v31 = vrot.slane %v132_v27, 2 }
  0x28   :  { %v392_v33 = vpop.eup %391  ;;  %v87_v34 = vmul.f32 0.6931472, %v390_v30 }
  0x29   :  { %v394_v37 = vpop.eup %393  ;;  %v89_v38 = vmul.f32 0.6931472, %v392_v33  ;;  %v134_v39 = vadd.f32 %v133_v31, %v132_v27 }
  0x2a   :  { %v396_v40 = vpop.eup %395  ;;  %v91_v41 = vmul.f32 0.6931472, %v394_v37  ;;  %v106_v42 = vsub.f32 0.0, %v87_v34  ;;  %v628_v37 = vadd.s32 8, %v551_v20 }
  0x2b   :  { %v398_v46 = vpop.eup %397  ;;  %v93_v47 = vmul.f32 0.6931472, %v396_v40  ;;  %v107_v48 = vsub.f32 0.0, %v89_v38  ;;  %v135_v49 = vrot.slane %v134_v39, 1 }
  0x2c   :  { %v400_v51 = vpop.eup %399  ;;  %v95_v52 = vmul.f32 0.6931472, %v398_v46  ;;  %v108_v53 = vsub.f32 0.0, %v91_v41  ;;  %v570_v54 = vadd.f32 %v143_v35, %v106_v42 }
  0x2d   :  { %v402_v56 = vpop.eup %401  ;;  %v97_v57 = vmul.f32 0.6931472, %v400_v51  ;;  %v109_v58 = vsub.f32 0.0, %v93_v47  ;;  %v136_v60 = vadd.f32 %v135_v49, %v134_v39  ;;  %v575_v61 = vadd.f32 %v143_v35, %v107_v48 }
  0x2e   :  { %v404_v62 = vpop.eup %403  ;;  %v99_v63 = vmul.f32 0.6931472, %v402_v56  ;;  %v110_v2 = vsub.f32 0.0, %v95_v52  ;;  %vm146_vm0 = vcmp.gt.f32.partialorder %v570_v54, -1e+09  ;;  %v578_v3 = vadd.f32 %v160_v44, %v108_v53 }
  0x2f   :  { %v406_v4 = vpop.eup %405  ;;  %v101_v5 = vmul.f32 0.6931472, %v404_v62  ;;  %v111_v6 = vsub.f32 0.0, %v97_v57  ;;  %413 = vlog2.f32 %v136_v60  ;;  %vm147_vm1 = vcmp.gt.f32.partialorder %v575_v61, -1e+09 }
  0x30   :  { %v408_v7 = vpop.eup %407  ;;  %v103_v8 = vmul.f32 0.6931472, %v406_v4  ;;  %v112_v9 = vsub.f32 0.0, %v99_v63  ;;  %v584_v10 = vsel %vm146_vm0, %v570_v54, -1e+09  ;;  %v586_v11 = vadd.f32 %v160_v44, %v109_v58 }
  0x31   :  { %v410_v12 = vpop.eup %409  ;;  %v105_v13 = vmul.f32 0.6931472, %v408_v7  ;;  %v113_v14 = vsub.f32 0.0, %v101_v5  ;;  %v591_v15 = vsel %vm147_vm1, %v575_v61, -1e+09  ;;  %vm163_vm2 = vcmp.gt.f32.partialorder %v578_v3, %v584_v10 }
  0x32   :  { %v412_v16 = vpop.eup %411  ;;  %v114_v17 = vsub.f32 0.0, %v103_v8  ;;  %v120_v18 = vmul.f32 0.6931472, %v410_v12  ;;  %vm164_vm3 = vcmp.gt.f32.partialorder %v586_v11, %v591_v15  ;;  %v602_v19 = vsel %vm163_vm2, %v578_v3, %v584_v10 }
  0x33   :  { %v115_v21 = vsub.f32 0.0, %v105_v13  ;;  %v609_v22 = vsel %vm164_vm3, %v586_v11, %v591_v15  ;;  %v167_v24 = vsel %vm163_vm2, 1, %v461_v23  ;;  %v168_v25 = vsel %vm164_vm3, 1, %v461_v23 }
  0x34   :  { %v121_v27 = vsub.f32 0.0, %v120_v18  ;;  %v617_v30 = vadd.f32 %v178_v45, %v110_v2  ;;  %v619_v31 = vadd.f32 %v178_v45, %v111_v6  ;;  %v621_v33 = vadd.f32 %v196_v50, %v112_v9 }
  0x35   :  { %v623_v34 = vadd.f32 %v196_v50, %v113_v14  ;;  %v625_v35 = vadd.f32 %v214_v55, %v114_v17  ;;  %v269_v38 = vrot.slane %v412_v16, 4  ;;  %v634_v39 = vadd.f32 %v214_v55, %v115_v21 }
  0x36   :  { %vm181_vm4 = vcmp.gt.f32.partialorder %v617_v30, %v602_v19  ;;  %vm182_vm5 = vcmp.gt.f32.partialorder %v619_v31, %v609_v22  ;;  %v637_v40 = vadd.f32 %v121_v27, %v504_v1 }
  0x37   :  { %v644_v41 = vsel %vm181_vm4, %v617_v30, %v602_v19  ;;  %v651_v42 = vsel %vm182_vm5, %v619_v31, %v609_v22  ;;  %v185_v44 = vsel %vm181_vm4, 2, %v167_v24  ;;  %v186_v45 = vsel %vm182_vm5, 2, %v168_v25 }
  0x38   :  { %vm199_vm6 = vcmp.gt.f32.partialorder %v621_v33, %v644_v41  ;;  %vm200_vm7 = vcmp.gt.f32.partialorder %v623_v34, %v651_v42  ;;  %v270_v46 = vadd.f32 %v412_v16, %v269_v38  ;;  %vm279_vm8 = vcmp.gt.f32.partialorder %v637_v40, -1e+09 }
  0x39   :  { %v669_v47 = vsel %vm199_vm6, %v621_v33, %v644_v41  ;;  %v676_v48 = vsel %vm200_vm7, %v623_v34, %v651_v42  ;;  %v203_v49 = vsel %vm199_vm6, 3, %v185_v44  ;;  %v204_v50 = vsel %vm200_vm7, 3, %v186_v45 }
  0x3a   :  { %vm217_vm9 = vcmp.gt.f32.partialorder %v625_v35, %v669_v47  ;;  %vm218_vm10 = vcmp.gt.f32.partialorder %v634_v39, %v676_v48  ;;  %v271_v51 = vrot.slane %v270_v46, 2  ;;  %v280_v52 = vsel %vm279_vm8, %v637_v40, -1e+09 }
  0x3b   :  { %v694_v53 = vsel %vm217_vm9, 4, %v203_v49  ;;  %v699_v55 = vsel %vm218_vm10, 4, %v204_v50  ;;  %v284_v56 = vrot.slane %v280_v52, 7 }
  0x3c   :  { %v414_v57 = vpop.eup %413  ;;  %vm230_vm11 = vcmp.eq.s32.totalorder %v694_v53, 4  ;;  %vm231_vm12 = vcmp.eq.s32.totalorder %v699_v55, 4  ;;  %v272_v58 = vadd.f32 %v271_v51, %v270_v46 }
  0x3d   :  { %v138_v60 = vmul.f32 0.6931472, %v414_v57  ;;  %v232_v62 = vsel %vm230_vm11, %v551_v20, 16  ;;  %v233_v63 = vsel %vm231_vm12, %v628_v37, 16  ;;  %vm706_vm13 = vcmp.gt.f32.partialorder %v637_v40, %v284_v56 }
  0x3e   :  { %vm234_vm14 = vcmp.lt.s32.totalorder %v232_v62, %v233_v63  ;;  %v273_v4 = vrot.slane %v272_v58, 1  ;;  %v288_v5 = vsel %vm706_vm13, 1, %v461_v23  ;;  %v287_v6 = vsel %vm706_vm13, %v637_v40, %v284_v56 }
  0x3f   :  { %v139_v7 = vadd.f32 %v138_v60, %v543_v43  ;;  %v235_v8 = vsel %vm234_vm14, %v232_v62, %v233_v63  ;;  %v298_v9 = vrot.slane %v288_v5, 7  ;;  %v294_v12 = vrot.slane %v287_v6, 7 }
  0x40   :  { %v236_v13 = vrot.slane %v235_v8, 4  ;;  %v274_v14 = vadd.f32 %v273_v4, %v272_v58 }
  0x41   :  { %v150_v16 = vsub.f32 %v499_v0, %v139_v7  ;;  %vm718_vm15 = vcmp.gt.f32.partialorder %v637_v40, %v294_v12 }
  0x42   :  { %vm237_vm11 = vcmp.lt.s32.totalorder %v235_v8, %v236_v13  ;;  %415 = vlog2.f32 %v274_v14  ;;  %v297_v18 = vsel %vm718_vm15, %v637_v40, %v294_v12  ;;  %v299_v43 = vsel %vm718_vm15, 2, %v298_v9 }
  0x43   :  { %v154_v21 = vrot.slane %v150_v16, %v142_v26  ;;  %v172_v0 = vrot.slane %v150_v16, %v159_v28  ;;  %v190_v23 = vrot.slane %v150_v16, %v177_v29  ;;  %v238_v24 = vsel %vm237_vm11, %v235_v8, %v236_v13 }
  0x44   :  { %v305_v25 = vrot.slane %v297_v18, 7  ;;  %v308_v27 = vrot.slane %v299_v43, 7  ;;  %v208_v45 = vrot.slane %v150_v16, %v195_v32  ;;  %v239_v46 = vrot.slane %v238_v24, 2 }
  0x45   :  { %v155_v38 = vsel %vm146_vm0, %v154_v21, 0.0  ;;  %v156_v44 = vsel %vm147_vm1, %v154_v21, 0.0  ;;  %v224_v3 = vrot.slane %v150_v16, %v213_v36  ;;  %vm317_vm1 = vcmask 1040384  }
  0x46   :  { %v173_v26 = vsel %vm163_vm2, %v172_v0, %v155_v38  ;;  %v174_v28 = vsel %vm164_vm3, %v172_v0, %v156_v44  ;;  %vm746_vm12 = vcmp.gt.f32.partialorder %v637_v40, %v305_v25  ;;  %vm240_vm0 = vcmp.lt.s32.totalorder %v238_v24, %v239_v46 }
  0x47   :  { %v191_v54 = vsel %vm181_vm4, %v190_v23, %v173_v26  ;;  %v192_v32 = vsel %vm182_vm5, %v190_v23, %v174_v28  ;;  %v309_v61 = vsel %vm746_vm12, 3, %v308_v27  ;;  %v241_v10 = vsel %vm240_vm0, %v238_v24, %v239_v46 }
  0x48   :  { %v209_v11 = vsel %vm199_vm6, %v208_v45, %v191_v54  ;;  %v210_v15 = vsel %vm200_vm7, %v208_v45, %v192_v32  ;;  %v242_v19 = vrot.slane %v241_v10, 1  ;;  %v316_v30 = vrot.slane %v309_v61, 2 }
  0x49   :  { %vm319_vm3 = vcmask 1041408   ;;  %v225_v36 = vsel %vm217_vm9, %v224_v3, %v209_v11  ;;  %v226_v22 = vsel %vm218_vm10, %v224_v3, %v210_v15 }
  0x4a   :  { %vm243_vm2 = vcmp.lt.s32.totalorder %v241_v10, %v242_v19 }
  0x4b   :  { %v244_v31 = vsel %vm243_vm2, %v241_v10, %v242_v19 }
  0x4c   :  { %vm245_vm4 = vcmp.lt.s32.totalorder %v551_v20, %v244_v31  ;;  %vm247_vm5 = vcmp.lt.s32.totalorder %v244_v31, 15  ;;  %vm246_vm6 = vcmp.lt.s32.totalorder %v628_v37, %v244_v31  ;;  %v318_v33 = vsel %vm317_vm1, %v244_v31, %v316_v30 }
  0x4d   :  { %v248_v34 = vsel %vm247_vm5, %v244_v31, 15  ;;  %v314_v41 = vsel %vm245_vm4, %v694_v53, 4294967295  ;;  %v315_v42 = vsel %vm246_vm6, %v699_v55, 4294967295  ;;  %v320_v35 = vsel %vm319_vm3, %v318_v33, 0 }
  0x4e   :  { %vm249_vm7 = vcmp.le.s32.totalorder %v551_v20, %v248_v34  ;;  %vm250_vm9 = vcmp.le.s32.totalorder %v628_v37, %v248_v34  ;;  %321 = vst [vmem:[#allocation2] sm:$0xff] %v314_v41  ;;  %322 = vst [vmem:[#allocation2 + $0x8] sm:$0xff] %v315_v42 }
  0x4f   :  { %v416_v47 = vpop.eup %415  ;;  %323 = vst [vmem:[#allocation2 + $0x10] sm:$0xff] %v320_v35  ;;  %v251_v39 = vsel %vm249_vm7, %v225_v36, 0.0  ;;  %v252_v48 = vsel %vm250_vm9, %v226_v22, 0.0 }
  0x50   :  { %v276_v49 = vmul.f32 0.6931472, %v416_v47 }
  0x51   :  { %428 = shalt.err (!%p425_p4)
}
  0x52   :  { %s463_s18 = smov 128   ;;  %s464_s19 = smov 8   ;;  %v253_v20 = vadd.f32 %v252_v48, %v251_v39  ;;  %v277_v37 = vadd.f32 %v276_v49, %v547_v59 }
  0x53   :  { %341 = dma.vmem_to_hbm [thread:$0]  %s336_s3, 384, %s802_s4, [#allocation3], %s463_s18, %s463_s18, %s464_s19  }
  0x54   :  { %v254_v50 = vrot.slane %v253_v20, 4  ;;  %v281_v51 = vsub.f32 %v504_v1, %v277_v37  ;;  %s465_s4 = smov [#allocation4]  }
  0x55   :  { %s348_s22 = sshll.u32 %s465_s4, 4  ;;  %s349_s22 = int_to_ptr.vmem [resolvable:$true] %s348_s22 }
  0x56   :  { %v255_v52 = vadd.f32 %v254_v50, %v253_v20  ;;  %v282_v53 = vsel %vm279_vm8, %v281_v51, 0.0  ;;  %s437_s23 = scalar_lea.vmem %s349_s22, 128  ;;  %p442_p6 = scmp.lt.s32.totalorder %s349_s22, %s349_s22 }
  0x57   :  { %v290_v55 = vrot.slane %v282_v53, 7  ;;  %p438_p5 = scmp.ne.s32.totalorder %s349_s22, %s437_s23  ;;  %p443_p7 = scmp.lt.s32.totalorder %s437_s23, %s437_s23 }
  0x58   :  { %v256_v56 = vrot.slane %v255_v52, 2 }
  0x59   :  { %v292_v57 = vsel %vm706_vm13, %v281_v51, %v290_v55  ;;  %p444_p8 = por %p443_p7, %p442_p6 }
  0x5a   :  { %v257_v58 = vadd.f32 %v256_v56, %v255_v52  ;;  %v301_v60 = vrot.slane %v292_v57, 7 }
  0x5b   :  { %p445_p9 = pnand %p444_p8, %p438_p5 }
  0x5c   :  { %v258_v62 = vrot.slane %v257_v58, 1  ;;  %v303_v63 = vsel %vm718_vm15, %v281_v51, %v301_v60 }
  0x5d   :  { %v311_v4 = vrot.slane %v303_v63, 7 }
  0x5e   :  { %v259_v59 = vadd.f32 %v258_v62, %v257_v58 }
  0x5f   :  { %v313_v1 = vsel %vm746_vm12, %v281_v51, %v311_v4 }
  0x60   :  { %v325_v40 = vrot.slane %v313_v1, 2 }
  0x62   :  { %v327_v5 = vsel %vm317_vm1, %v259_v59, %v325_v40 }
  0x63   :  { %v328_v2 = vsel %vm319_vm3, %v327_v5, 0.0 }
  0x64   :  { %329 = vst [vmem:[#allocation4] sm:$0xff] %v328_v2 }
  0x65   :  { %448 = shalt.err (!%p445_p9)
}
  0x66   :  { %351 = dma.vmem_to_hbm [thread:$0]  %s349_s22, 128, %s803_s5, [#allocation5]  }
  0x67   :  { %457 = dma.done.wait [#allocation3], 384  }
  0x68   :  { %458 = vsyncadd [#allocation3], 4294966912 }
  0x69   :  { %459 = dma.done.wait [#allocation5], 128  }
  0x6a   :  { %460 = vsyncadd [#allocation5], 4294967168 }
  0x6b   :  { %358 = vsyncpa [#allocation3], 1 }
  0x6c   :  { %359 = vsyncpa [#allocation5], 1 }

</bundles_post_ra>
